<compile_context>
chip_gen: v5e
topology: v5e:2x2
jax: 0.10.0
libtpu: 0.0.40
codegen_flags: <defaults>
</compile_context>

<pallas_src>
import functools

import jax
import jax.numpy as jnp
from jax import lax
from jax.experimental import pallas as pl
from jax.experimental.pallas import tpu as pltpu

LANES = 128
SUBLANES = 8
_SLAB = SUBLANES * LANES  # 1024 elements = one f32 vreg


def _hloss_kernel(x_ref, o_ref, *, total_rows, tile_rows, inner_tiles):
    # x_ref: (tile_rows, 128) tile of the flattened aligned prefix (native dtype)
    # o_ref: (1, 8, 128) f32 partial-sum accumulator for this parallel split
    p = pl.program_id(0)   # parallel split (engages both TCs on multi-core chips)
    i = pl.program_id(1)   # sequential streaming reduction over tiles

    @pl.when(i == 0)
    def _():
        o_ref[...] = jnp.zeros_like(o_ref)

    # Row-based tile offset (int32 is ample: rows = elements / 128).
    blk = p * inner_tiles + i
    base_row = blk * tile_rows

    x = x_ref[...].astype(jnp.float32)

    def accumulate(term):
        # Per-vreg partial sums: pure VALU adds; final reduce is in the wrapper.
        o_ref[...] += term.reshape(
            tile_rows // SUBLANES, SUBLANES, LANES).sum(axis=0)[None]

    # Only the last (partial) tile or a clamped duplicate tile on an
    # overshooting split needs masking; everything else takes the fast path.
    needs_mask = base_row + tile_rows > total_rows

    @pl.when(jnp.logical_not(needs_mask))
    def _():
        accumulate(x * jnp.log(x))

    @pl.when(needs_mask)
    def _():
        row = lax.broadcasted_iota(jnp.int32, (tile_rows, LANES), 0)
        ok = (base_row + row) < total_rows
        xv = jnp.where(ok, x, 1.0)           # 1*log(1) = 0 for invalid rows
        accumulate(xv * jnp.log(xv))


def _num_tensorcores():
    # 2 on v7x (2 TCs/chip), 1 on v5e/v6e.  getattr keeps this safe everywhere.
    try:
        return max(1, int(getattr(jax.devices()[0], "num_cores", 1)))
    except Exception:
        return 1


def hloss(x, *, tile_rows=8192, num_splits=None):
    """Computes -mean(x * log(x)) over all elements of x (any shape, x > 0)."""
    n = x.size
    flat = x.reshape(-1)                  # free for contiguous inputs

    n_main = (n // _SLAB) * _SLAB         # aligned prefix handled by the kernel
    rows = n_main // LANES                # always a multiple of 8

    total = jnp.float32(0.0)

    if rows > 0:
        # Prefix slice: identity for aligned sizes; at worst a prefix-only copy
        # for unaligned ones (never a full padded-array materialization).
        x2d = flat[:n_main].reshape(rows, LANES)

        itemsize = jnp.dtype(x.dtype).itemsize
        packing = max(1, 4 // max(1, itemsize))
        row_align = SUBLANES * packing    # 8 f32 / 16 bf16 / 32 int8
        tr = min(int(tile_rows), rows)
        if tr < rows:
            tr = max(row_align, (tr // row_align) * row_align)
        n_tiles = -(-rows // tr)

        ns = _num_tensorcores() if num_splits is None else int(num_splits)
        ns = max(1, min(ns, n_tiles))
        inner = -(-n_tiles // ns)

        # Clamp the block index so an overshooting last split never issues an
        # out-of-range DMA; its (fully masked) contribution is zero.
        def x_index_map(p, i):
            return (jnp.minimum(p * inner + i, n_tiles - 1), 0)

        partials = pl.pallas_call(
            functools.partial(_hloss_kernel, total_rows=rows, tile_rows=tr,
                              inner_tiles=inner),
            out_shape=jax.ShapeDtypeStruct((ns, SUBLANES, LANES), jnp.float32),
            grid_spec=pltpu.PrefetchScalarGridSpec(
                num_scalar_prefetch=0,
                grid=(ns, inner),
                in_specs=[pl.BlockSpec((tr, LANES), x_index_map)],
                out_specs=pl.BlockSpec((1, SUBLANES, LANES),
                                       lambda p, i: (p, 0, 0)),
            ),
            compiler_params=pltpu.CompilerParams(
                dimension_semantics=("parallel", "arbitrary"),
                vmem_limit_bytes=32 * 1024 * 1024),
        )(x2d)
        total = total + jnp.sum(partials)

    if n_main < n:
        # Unaligned tail (< 1024 elements): tiny jnp fold-in, no padding copy.
        tail = flat[n_main:].astype(jnp.float32)
        total = total + jnp.sum(tail * jnp.log(tail))

    # Final tiny reduce + mean in the wrapper.
    return -total / n


if __name__ == "__main__":
    key = jax.random.PRNGKey(0)
    # Small NCHW input; strictly positive (log domain), e.g. probabilities.
    x = jax.random.uniform(key, (2, 4, 16, 16), dtype=jnp.float32,
                           minval=1e-3, maxval=1.0)
    result = jax.block_until_ready(hloss(x))
    ref = -jnp.mean(x * jnp.log(x))
    assert jnp.allclose(result, ref, rtol=1e-5, atol=1e-6), (result, ref)

    # Unaligned size: exercises the aligned-prefix kernel + jnp tail fold.
    x2 = jax.random.uniform(jax.random.PRNGKey(1), (3, 5, 7, 11),
                            dtype=jnp.float32, minval=1e-3, maxval=1.0)
    r2 = jax.block_until_ready(hloss(x2))
    ref2 = -jnp.mean(x2 * jnp.log(x2))
    assert jnp.allclose(r2, ref2, rtol=1e-5, atol=1e-6), (r2, ref2)

    # Multi-tile reduction with a masked partial last tile (small tile override).
    x3 = jax.random.uniform(jax.random.PRNGKey(2), (5, 1000),
                            dtype=jnp.float32, minval=1e-3, maxval=1.0)
    r3 = jax.block_until_ready(hloss(x3, tile_rows=24))
    ref3 = -jnp.mean(x3 * jnp.log(x3))
    assert jnp.allclose(r3, ref3, rtol=1e-5, atol=1e-6), (r3, ref3)

    print("KERNEL_OK")
</pallas_src>

<mosaic_0001>
module attributes {stable_mosaic.version = 11 : i64} {
  func.func @_hloss_kernel(%arg0: i32, %arg1: i32, %arg2: memref<16x128xf32, #tpu.memory_space<vmem>>, %arg3: memref<1x8x128xf32, #tpu.memory_space<vmem>>) attributes {dimension_semantics = [#tpu.dimension_semantics<parallel>, #tpu.dimension_semantics<arbitrary>], iteration_bounds = array<i64: 1, 1>, scalar_prefetch = 0 : i64, scratch_operands = 0 : i64, tpu.core_type = #tpu.core_type<tc>, window_params = [{transform_indices = @transform_0, window_bounds = array<i64: 16, 128>}, {transform_indices = @transform_1, window_bounds = array<i64: 1, 8, 128>}]} {
    %c0_i32 = arith.constant 0 : i32
    %0 = arith.cmpi eq, %arg1, %c0_i32 : i32
    %1 = arith.extui %0 : i1 to i32
    %c0_i32_0 = arith.constant 0 : i32
    %2 = arith.cmpi ne, %1, %c0_i32_0 : i32
    scf.if %2 {
      %cst = arith.constant 0.000000e+00 : f32
      %14 = vector.broadcast %cst : f32 to vector<1x8x128xf32>
      %c0_6 = arith.constant 0 : index
      %c0_7 = arith.constant 0 : index
      %c0_8 = arith.constant 0 : index
      %15 = vector.load %arg3[%c0_6, %c0_7, %c0_8] : memref<1x8x128xf32, #tpu.memory_space<vmem>>, vector<1x8x128xf32>
      tpu.vector_store %arg3[%c0_6, %c0_7, %c0_8], %14 {strides = array<i32>} : memref<1x8x128xf32, #tpu.memory_space<vmem>>, vector<1x8x128xf32>,
    } else {
    }
    %c1_i32 = arith.constant 1 : i32
    %3 = arith.muli %arg0, %c1_i32 : i32
    %4 = arith.addi %3, %arg1 : i32
    %c16_i32 = arith.constant 16 : i32
    %5 = arith.muli %4, %c16_i32 : i32
    %c0 = arith.constant 0 : index
    %c0_1 = arith.constant 0 : index
    %6 = vector.load %arg2[%c0, %c0_1] : memref<16x128xf32, #tpu.memory_space<vmem>>, vector<16x128xf32>
    %c16_i32_2 = arith.constant 16 : i32
    %7 = arith.addi %5, %c16_i32_2 : i32
    %c16_i32_3 = arith.constant 16 : i32
    %8 = arith.cmpi sgt, %7, %c16_i32_3 : i32
    %true = arith.constant true
    %9 = arith.xori %8, %true : i1
    %10 = arith.extui %9 : i1 to i32
    %c0_i32_4 = arith.constant 0 : i32
    %11 = arith.cmpi ne, %10, %c0_i32_4 : i32
    scf.if %11 {
      %14 = math.log %6 : vector<16x128xf32>
      %15 = arith.mulf %6, %14 : vector<16x128xf32>
      %c0_6 = arith.constant 0 : index
      %c0_7 = arith.constant 0 : index
      %c0_8 = arith.constant 0 : index
      %16 = vector.load %arg3[%c0_6, %c0_7, %c0_8] : memref<1x8x128xf32, #tpu.memory_space<vmem>>, vector<1x8x128xf32>
      %17 = vector.shape_cast %15 : vector<16x128xf32> to vector<2x8x128xf32>
      %cst = arith.constant dense<0.000000e+00> : vector<8x128xf32>
      %18 = vector.multi_reduction <add>, %17, %cst [0] : vector<2x8x128xf32> to vector<8x128xf32>
      %19 = vector.shape_cast %18 : vector<8x128xf32> to vector<1x8x128xf32>
      %20 = arith.addf %16, %19 : vector<1x8x128xf32>
      %c0_9 = arith.constant 0 : index
      %c0_10 = arith.constant 0 : index
      %c0_11 = arith.constant 0 : index
      %21 = vector.load %arg3[%c0_9, %c0_10, %c0_11] : memref<1x8x128xf32, #tpu.memory_space<vmem>>, vector<1x8x128xf32>
      tpu.vector_store %arg3[%c0_9, %c0_10, %c0_11], %20 {strides = array<i32>} : memref<1x8x128xf32, #tpu.memory_space<vmem>>, vector<1x8x128xf32>,
    } else {
    }
    %12 = arith.extui %8 : i1 to i32
    %c0_i32_5 = arith.constant 0 : i32
    %13 = arith.cmpi ne, %12, %c0_i32_5 : i32
    scf.if %13 {
      %14 = tpu.iota {dimensions = array<i32: 0>} : vector<16x128xi32>
      %15 = vector.broadcast %5 : i32 to vector<16x128xi32>
      %16 = arith.addi %15, %14 : vector<16x128xi32>
      %c16_i32_6 = arith.constant 16 : i32
      %17 = vector.broadcast %c16_i32_6 : i32 to vector<16x128xi32>
      %18 = arith.cmpi slt, %16, %17 : vector<16x128xi32>
      %cst = arith.constant 1.000000e+00 : f32
      %19 = vector.broadcast %cst : f32 to vector<16x128xf32>
      %20 = arith.select %18, %6, %19 : vector<16x128xi1>, vector<16x128xf32>
      %21 = math.log %20 : vector<16x128xf32>
      %22 = arith.mulf %20, %21 : vector<16x128xf32>
      %c0_7 = arith.constant 0 : index
      %c0_8 = arith.constant 0 : index
      %c0_9 = arith.constant 0 : index
      %23 = vector.load %arg3[%c0_7, %c0_8, %c0_9] : memref<1x8x128xf32, #tpu.memory_space<vmem>>, vector<1x8x128xf32>
      %24 = vector.shape_cast %22 : vector<16x128xf32> to vector<2x8x128xf32>
      %cst_10 = arith.constant dense<0.000000e+00> : vector<8x128xf32>
      %25 = vector.multi_reduction <add>, %24, %cst_10 [0] : vector<2x8x128xf32> to vector<8x128xf32>
      %26 = vector.shape_cast %25 : vector<8x128xf32> to vector<1x8x128xf32>
      %27 = arith.addf %23, %26 : vector<1x8x128xf32>
      %c0_11 = arith.constant 0 : index
      %c0_12 = arith.constant 0 : index
      %c0_13 = arith.constant 0 : index
      %28 = vector.load %arg3[%c0_11, %c0_12, %c0_13] : memref<1x8x128xf32, #tpu.memory_space<vmem>>, vector<1x8x128xf32>
      tpu.vector_store %arg3[%c0_11, %c0_12, %c0_13], %27 {strides = array<i32>} : memref<1x8x128xf32, #tpu.memory_space<vmem>>, vector<1x8x128xf32>,
    } else {
    }
    return
  }
  func.func @transform_0(%arg0: i32, %arg1: i32) -> (i32, i32) {
    %c1_i32 = arith.constant 1 : i32
    %0 = arith.muli %arg0, %c1_i32 : i32
    %1 = arith.addi %0, %arg1 : i32
    %c0_i32 = arith.constant 0 : i32
    %2 = arith.minsi %1, %c0_i32 : i32
    %c0_i32_0 = arith.constant 0 : i32
    %c0_i32_1 = arith.constant 0 : i32
    return %2, %c0_i32_0 : i32, i32
  }
  func.func @transform_1(%arg0: i32, %arg1: i32) -> (i32, i32, i32) {
    %c0_i32 = arith.constant 0 : i32
    %c0_i32_0 = arith.constant 0 : i32
    %c0_i32_1 = arith.constant 0 : i32
    return %arg0, %c0_i32, %c0_i32_0 : i32, i32, i32
  }
}

</mosaic_0001>

<bundles_post_ra>
// kernel: tpu_custom_call.1
= control target key start
LH: loop header
LB: loop body
LE: loop exit
PB: predicated region body
PF: predicated region fallthrough
CT: control target
= control target key end

     0   :  { %6 = vsyncpa [#allocation3], 0  ;;  %s183_s0 = inlined_call_operand.hbm [shape: f32[16,128], index: 0, kind: input, shape index: {}]   ;;  %s184_s1 = inlined_call_operand.hbm [shape: f32[1,8,128], index: 1, kind: output, shape index: {}]  }
   0x1   :  { %7 = vsyncpa [#allocation4], 0  ;;  %s18_s8 = sshll.u32 %s183_s0, 4  ;;  %s163_s9 = smov [#allocation2]   ;;  %s19_s8 = int_to_ptr.hbm [resolvable:$true] %s18_s8 }
   0x2   :  { %s20_s10 = sshll.u32 %s163_s9, 4  ;;  %s164_s11 = smov 128   ;;  %s21_s10 = int_to_ptr.vmem [resolvable:$true] %s20_s10 }
   0x3   :  { %s165_s12 = smov 8  }
   0x4   :  { %26 = dma.hbm_to_vmem [thread:$0]  %s19_s8, 256, %s21_s10, [#allocation3], %s164_s11, %s164_s11, %s165_s12  }
   0x5   :  { %159 = dma.done.wait [#allocation3], 256  }
   0x6   :  { %160 = vsyncadd [#allocation3], 4294967040  ;;  %v42_v0 = vld [vmem:[#allocation2] sm:$0xff]  ;;  %v43_v1 = vld [vmem:[#allocation2 + $0x8] sm:$0xff]  ;;  %s166_s0 = smov [#allocation5]   ;;  %s90_s16 = sshll.u32 %s184_s1, 4  ;;  %s91_s16 = int_to_ptr.hbm [resolvable:$true] %s90_s16 }
   0x7   :  { %107 = vlog2.f32 %v42_v0  ;;  %s88_s13 = sshll.u32 %s166_s0, 4  ;;  %s89_s13 = int_to_ptr.vmem [resolvable:$true] %s88_s13 }
   0x8   :  { %109 = vlog2.f32 %v43_v1 }
   0xd   :  { %v108_v2 = vpop.eup %107 }
   0xe   :  { %v110_v3 = vpop.eup %109  ;;  %v51_v4 = vmul.f32 0.6931472, %v108_v2 }
   0xf   :  { %v53_v5 = vmul.f32 0.6931472, %v110_v3 }
  0x10   :  { %v54_v6 = vmul.f32 %v51_v4, %v42_v0 }
  0x11   :  { %v55_v7 = vmul.f32 %v53_v5, %v43_v1 }
  0x13   :  { %v57_v8 = vadd.f32 %v55_v7, %v54_v6 }
  0x15   :  { %59 = vst [vmem:[#allocation5] sm:$0xff] %v57_v8 }
  0x16   :  { %93 = dma.vmem_to_hbm [thread:$0]  %s89_s13, 128, %s91_s16, [#allocation4]  }
  0x17   :  { %161 = dma.done.wait [#allocation4], 128  }
  0x18   :  { %162 = vsyncadd [#allocation4], 4294967168 }
  0x19   :  { %98 = vsyncpa [#allocation3], 1 }
  0x1a   :  { %99 = vsyncpa [#allocation4], 1 }

</bundles_post_ra>
